<compile_context>
chip_gen: v5e
topology: v5e:2x2
jax: 0.10.0
libtpu: 0.0.40
codegen_flags: <defaults>
</compile_context>

<pallas_src>
import functools

import jax
import jax.numpy as jnp
from jax.experimental import pallas as pl
from jax.experimental.pallas import tpu as pltpu


def _round_up(x, m):
    return ((x + m - 1) // m) * m


# ----------------------------- Pallas kernel -------------------------------

def _conv_gemm_kernel(a_ref, w_ref, shift_ref, o_ref, acc_ref, *, negative_slope):
    """Fused im2col-GEMM tile + per-channel shift + optional LeakyReLU.

    a_ref:     (tm, tk)   bf16 im2col patches tile
    w_ref:     (tk, tn)   bf16 flattened conv weights (scale pre-folded)
    shift_ref: (1,  tn)   f32 per-channel shift (BN beta-mean*scale or bias)
    o_ref:     (tm, tn)   output tile (bf16 inner layers / f32 final layer)
    acc_ref:   (tm, tn)   f32 VMEM scratch accumulator
    """
    k = pl.program_id(2)

    @pl.when(k == 0)
    def _():
        acc_ref[...] = jnp.zeros_like(acc_ref)

    acc_ref[...] += jnp.dot(a_ref[...], w_ref[...],
                            preferred_element_type=jnp.float32)

    @pl.when(k == pl.num_programs(2) - 1)
    def _():
        y = acc_ref[...] + shift_ref[...]
        if negative_slope is not None:
            y = jnp.where(y >= 0.0, y, negative_slope * y)
        o_ref[...] = y.astype(o_ref.dtype)


def conv2d_fused(x_nhwc, w_hwio, scale, shift, *, stride, negative_slope,
                 out_dtype=jnp.bfloat16):
    """Conv2d(k=4, pad=1) + per-channel affine + optional LeakyReLU via Pallas."""
    N, H, W, Cin = x_nhwc.shape
    kh, kw, _, Cout = w_hwio.shape
    pad = 1
    xp = jnp.pad(x_nhwc.astype(jnp.bfloat16),
                 ((0, 0), (pad, pad), (pad, pad), (0, 0)))
    Hp, Wp = H + 2 * pad, W + 2 * pad
    Hout = (Hp - kh) // stride + 1
    Wout = (Wp - kw) // stride + 1

    # im2col (glue, bf16): patch ordering (kh, kw, Cin) matches weight flatten order.
    cols = []
    for i in range(kh):
        for j in range(kw):
            cols.append(
                jax.lax.slice(
                    xp,
                    (0, i, j, 0),
                    (N, i + (Hout - 1) * stride + 1,
                     j + (Wout - 1) * stride + 1, Cin),
                    (1, stride, stride, 1),
                )
            )
    patches = jnp.stack(cols, axis=3)                      # (N, Ho, Wo, kh*kw, Cin)
    M = N * Hout * Wout
    K = kh * kw * Cin
    A = patches.reshape(M, K)                              # bf16 (M, K)

    # Fold the per-channel scale into the weight columns; cast to bf16.
    B = (w_hwio.reshape(K, Cout).astype(jnp.float32)
         * scale.reshape(1, Cout).astype(jnp.float32)).astype(jnp.bfloat16)

    # Lane-dense zero padding (multiples of 128) + tile selection.
    Kp = _round_up(K, 128)
    Cp = _round_up(Cout, 128)
    tk = 512 if Kp % 512 == 0 else (256 if Kp % 256 == 0 else 128)
    tn = 256 if Cp % 256 == 0 else 128
    tm = min(512, _round_up(M, 8))
    Mp = _round_up(M, tm)

    A = jnp.pad(A, ((0, Mp - M), (0, Kp - K)))
    B = jnp.pad(B, ((0, Kp - K), (0, Cp - Cout)))
    shift2 = jnp.pad(shift.reshape(1, Cout).astype(jnp.float32),
                     ((0, 0), (0, Cp - Cout)))

    out_itemsize = jnp.dtype(out_dtype).itemsize
    cost = pl.CostEstimate(
        flops=2 * Mp * Kp * Cp,
        transcendentals=0,
        bytes_accessed=(A.size * 2 + B.size * 2 + shift2.size * 4
                        + Mp * Cp * out_itemsize),
    )

    kernel = functools.partial(_conv_gemm_kernel, negative_slope=negative_slope)
    out = pl.pallas_call(
        kernel,
        out_shape=jax.ShapeDtypeStruct((Mp, Cp), out_dtype),
        grid_spec=pltpu.PrefetchScalarGridSpec(
            num_scalar_prefetch=0,
            grid=(Mp // tm, Cp // tn, Kp // tk),
            in_specs=[
                pl.BlockSpec((tm, tk), lambda i, j, k: (i, k)),
                pl.BlockSpec((tk, tn), lambda i, j, k: (k, j)),
                pl.BlockSpec((1, tn), lambda i, j, k: (0, j)),
            ],
            out_specs=pl.BlockSpec((tm, tn), lambda i, j, k: (i, j)),
            scratch_shapes=[pltpu.VMEM((tm, tn), jnp.float32)],
        ),
        compiler_params=pltpu.CompilerParams(
            dimension_semantics=("parallel", "parallel", "arbitrary")),
        cost_estimate=cost,
    )(A, B, shift2)

    return out[:M, :Cout].reshape(N, Hout, Wout, Cout)


# --------------------------- model construction ----------------------------

def init_nlayer_discriminator(key, input_nc, ndf=64, n_layers=3):
    """Deterministic synthetic parameters for NLayerDiscriminator (BatchNorm2d norm)."""
    kw_ = 4
    eps = 1e-5
    layers = []

    def conv_w(k, cin, cout):
        return 0.02 * jax.random.normal(k, (kw_, kw_, cin, cout), jnp.float32)  # HWIO

    def bn_scale_shift(c):
        gamma = jnp.ones((c,), jnp.float32)
        beta = jnp.zeros((c,), jnp.float32)
        running_mean = jnp.zeros((c,), jnp.float32)
        running_var = jnp.ones((c,), jnp.float32)
        scale = gamma / jnp.sqrt(running_var + eps)
        shift = beta - running_mean * scale
        return scale, shift

    keys = jax.random.split(key, n_layers + 2 + 2)

    # Layer 0: Conv(input_nc -> ndf, s=2, bias=True) + LeakyReLU(0.2)
    layers.append(dict(
        w=conv_w(keys[0], input_nc, ndf),
        scale=jnp.ones((ndf,), jnp.float32),
        shift=0.02 * jax.random.normal(keys[1], (ndf,), jnp.float32),  # conv bias
        stride=2, slope=0.2,
    ))

    nf_mult = 1
    for n in range(1, n_layers):
        nf_mult_prev = nf_mult
        nf_mult = min(2 ** n, 8)
        cin, cout = ndf * nf_mult_prev, ndf * nf_mult
        scale, shift = bn_scale_shift(cout)
        layers.append(dict(
            w=conv_w(keys[1 + n], cin, cout),      # bias=False (BatchNorm)
            scale=scale, shift=shift, stride=2, slope=0.2,
        ))

    nf_mult_prev = nf_mult
    nf_mult = min(2 ** n_layers, 8)
    cin, cout = ndf * nf_mult_prev, ndf * nf_mult
    scale, shift = bn_scale_shift(cout)
    layers.append(dict(
        w=conv_w(keys[1 + n_layers], cin, cout),   # bias=False (BatchNorm)
        scale=scale, shift=shift, stride=1, slope=0.2,
    ))

    # Final: Conv(-> 1, s=1, bias=True), no activation
    layers.append(dict(
        w=conv_w(keys[2 + n_layers], cout, 1),
        scale=jnp.ones((1,), jnp.float32),
        shift=0.02 * jax.random.normal(keys[3 + n_layers], (1,), jnp.float32),
        stride=1, slope=None,
    ))
    return layers


def nlayer_discriminator_forward(layers, x_nchw):
    """Forward pass. Input/output in NCHW (PyTorch convention)."""
    x = jnp.transpose(x_nchw, (0, 2, 3, 1))  # -> NHWC
    n_layers = len(layers)
    for li, lyr in enumerate(layers):
        out_dtype = jnp.float32 if li == n_layers - 1 else jnp.bfloat16
        x = conv2d_fused(x, lyr["w"], lyr["scale"], lyr["shift"],
                         stride=lyr["stride"], negative_slope=lyr["slope"],
                         out_dtype=out_dtype)
    return jnp.transpose(x, (0, 3, 1, 2))    # -> NCHW


# ------------------------------- reference ---------------------------------

def _reference_forward(layers, x_nchw):
    """Pure-JAX reference with the same bf16 operand / f32 accumulate recipe."""
    x = jnp.transpose(x_nchw, (0, 2, 3, 1))
    n_layers = len(layers)
    for li, lyr in enumerate(layers):
        xb = x.astype(jnp.bfloat16)
        wf = (lyr["w"].astype(jnp.float32)
              * lyr["scale"][None, None, None, :]).astype(jnp.bfloat16)
        y = jax.lax.conv_general_dilated(
            xb, wf, window_strides=(lyr["stride"], lyr["stride"]),
            padding=((1, 1), (1, 1)),
            dimension_numbers=("NHWC", "HWIO", "NHWC"),
            preferred_element_type=jnp.float32)
        y = y + lyr["shift"][None, None, None, :]
        if lyr["slope"] is not None:
            y = jnp.where(y >= 0.0, y, lyr["slope"] * y)
        x = y.astype(jnp.float32 if li == n_layers - 1 else jnp.bfloat16)
    return jnp.transpose(x.astype(jnp.float32), (0, 3, 1, 2))


# --------------------------------- main -------------------------------------

if __name__ == "__main__":
    key = jax.random.PRNGKey(0)
    k_param, k_x = jax.random.split(key)

    # Small config consistent with the module: input_nc=4, ndf=16, n_layers=3.
    input_nc, ndf, n_layers = 4, 16, 3
    layers = init_nlayer_discriminator(k_param, input_nc, ndf=ndf, n_layers=n_layers)

    # NCHW input (PyTorch convention): 32x32 spatial -> (2, 1, 2, 2) output.
    x = jax.random.normal(k_x, (2, input_nc, 32, 32), jnp.float32)

    out = nlayer_discriminator_forward(layers, x)
    out = jax.block_until_ready(out)

    ref = jax.block_until_ready(_reference_forward(layers, x))
    assert out.shape == ref.shape == (2, 1, 2, 2), out.shape
    assert jnp.allclose(out, ref, rtol=2e-2, atol=2e-2), \
        float(jnp.max(jnp.abs(out - ref)))

    print("KERNEL_OK")
</pallas_src>

<mosaic_0001>
module attributes {stable_mosaic.version = 11 : i64} {
  func.func @_conv_gemm_kernel(%arg0: i32, %arg1: i32, %arg2: i32, %arg3: memref<512x128xbf16, #tpu.memory_space<vmem>>, %arg4: memref<128x128xbf16, #tpu.memory_space<vmem>>, %arg5: memref<1x128xf32, #tpu.memory_space<vmem>>, %arg6: memref<512x128xbf16, #tpu.memory_space<vmem>>, %arg7: memref<512x128xf32, #tpu.memory_space<vmem>>) attributes {dimension_semantics = [#tpu.dimension_semantics<parallel>, #tpu.dimension_semantics<parallel>, #tpu.dimension_semantics<arbitrary>], iteration_bounds = array<i64: 1, 1, 1>, scalar_prefetch = 0 : i64, scratch_operands = 1 : i64, tpu.core_type = #tpu.core_type<tc>, window_params = [{transform_indices = @transform_0, window_bounds = array<i64: 512, 128>}, {transform_indices = @transform_1, window_bounds = array<i64: 128, 128>}, {transform_indices = @transform_2, window_bounds = array<i64: 1, 128>}, {transform_indices = @transform_3, window_bounds = array<i64: 512, 128>}]} {
    %c0_i32 = arith.constant 0 : i32
    %0 = arith.cmpi eq, %arg2, %c0_i32 : i32
    %1 = arith.extui %0 : i1 to i32
    %c0_i32_0 = arith.constant 0 : i32
    %2 = arith.cmpi ne, %1, %c0_i32_0 : i32
    scf.if %2 {
      %cst_10 = arith.constant 0.000000e+00 : f32
      %12 = vector.broadcast %cst_10 : f32 to vector<512x128xf32>
      %c0_11 = arith.constant 0 : index
      %c0_12 = arith.constant 0 : index
      %13 = vector.load %arg7[%c0_11, %c0_12] : memref<512x128xf32, #tpu.memory_space<vmem>>, vector<512x128xf32>
      tpu.vector_store %arg7[%c0_11, %c0_12], %12 {strides = array<i32>} : memref<512x128xf32, #tpu.memory_space<vmem>>, vector<512x128xf32>,
    } else {
    }
    %c0 = arith.constant 0 : index
    %c0_1 = arith.constant 0 : index
    %3 = vector.load %arg7[%c0, %c0_1] : memref<512x128xf32, #tpu.memory_space<vmem>>, vector<512x128xf32>
    %c0_2 = arith.constant 0 : index
    %c0_3 = arith.constant 0 : index
    %4 = vector.load %arg3[%c0_2, %c0_3] : memref<512x128xbf16, #tpu.memory_space<vmem>>, vector<512x128xbf16>
    %c0_4 = arith.constant 0 : index
    %c0_5 = arith.constant 0 : index
    %5 = vector.load %arg4[%c0_4, %c0_5] : memref<128x128xbf16, #tpu.memory_space<vmem>>, vector<128x128xbf16>
    %cst = arith.constant dense<0.000000e+00> : vector<512x128xf32>
    %6 = tpu.matmul %4, %5, %cst {dimension_numbers = #tpu.dot_dimension_numbers<[1], [0], [0], [1], [0, 0, 1, 1], [], []>} : vector<512x128xbf16>, vector<128x128xbf16>, vector<512x128xf32> -> vector<512x128xf32>
    %7 = arith.addf %3, %6 : vector<512x128xf32>
    %c0_6 = arith.constant 0 : index
    %c0_7 = arith.constant 0 : index
    %8 = vector.load %arg7[%c0_6, %c0_7] : memref<512x128xf32, #tpu.memory_space<vmem>>, vector<512x128xf32>
    tpu.vector_store %arg7[%c0_6, %c0_7], %7 {strides = array<i32>} : memref<512x128xf32, #tpu.memory_space<vmem>>, vector<512x128xf32>,
    %c0_i32_8 = arith.constant 0 : i32
    %9 = arith.cmpi eq, %arg2, %c0_i32_8 : i32
    %10 = arith.extui %9 : i1 to i32
    %c0_i32_9 = arith.constant 0 : i32
    %11 = arith.cmpi ne, %10, %c0_i32_9 : i32
    scf.if %11 {
      %c0_10 = arith.constant 0 : index
      %c0_11 = arith.constant 0 : index
      %12 = vector.load %arg7[%c0_10, %c0_11] : memref<512x128xf32, #tpu.memory_space<vmem>>, vector<512x128xf32>
      %c0_12 = arith.constant 0 : index
      %c0_13 = arith.constant 0 : index
      %13 = vector.load %arg5[%c0_12, %c0_13] : memref<1x128xf32, #tpu.memory_space<vmem>>, vector<1x128xf32>
      %14 = vector.broadcast %13 : vector<1x128xf32> to vector<512x128xf32>
      %15 = arith.addf %12, %14 : vector<512x128xf32>
      %cst_14 = arith.constant 0.000000e+00 : f32
      %16 = vector.broadcast %cst_14 : f32 to vector<512x128xf32>
      %17 = arith.cmpf oge, %15, %16 : vector<512x128xf32>
      %cst_15 = arith.constant 2.000000e-01 : f32
      %18 = vector.broadcast %cst_15 : f32 to vector<512x128xf32>
      %19 = arith.mulf %18, %15 : vector<512x128xf32>
      %20 = arith.select %17, %15, %19 : vector<512x128xi1>, vector<512x128xf32>
      %21 = arith.truncf %20 : vector<512x128xf32> to vector<512x128xbf16>
      %c0_16 = arith.constant 0 : index
      %c0_17 = arith.constant 0 : index
      %22 = vector.load %arg6[%c0_16, %c0_17] : memref<512x128xbf16, #tpu.memory_space<vmem>>, vector<512x128xbf16>
      tpu.vector_store %arg6[%c0_16, %c0_17], %21 {strides = array<i32>} : memref<512x128xbf16, #tpu.memory_space<vmem>>, vector<512x128xbf16>,
    } else {
    }
    return
  }
  func.func @transform_0(%arg0: i32, %arg1: i32, %arg2: i32) -> (i32, i32) {
    %c0_i32 = arith.constant 0 : i32
    return %arg0, %arg2 : i32, i32
  }
  func.func @transform_1(%arg0: i32, %arg1: i32, %arg2: i32) -> (i32, i32) {
    %c0_i32 = arith.constant 0 : i32
    return %arg2, %arg1 : i32, i32
  }
  func.func @transform_2(%arg0: i32, %arg1: i32, %arg2: i32) -> (i32, i32) {
    %c0_i32 = arith.constant 0 : i32
    %c0_i32_0 = arith.constant 0 : i32
    return %c0_i32, %arg1 : i32, i32
  }
  func.func @transform_3(%arg0: i32, %arg1: i32, %arg2: i32) -> (i32, i32) {
    %c0_i32 = arith.constant 0 : i32
    return %arg0, %arg1 : i32, i32
  }
}

</mosaic_0001>

<bundles_post_ra>
// kernel: tpu_custom_call.1
= control target key start
LH: loop header
LB: loop body
LE: loop exit
PB: predicated region body
PF: predicated region fallthrough
CT: control target
= control target key end

     0   :  { %8 = vsyncpa [#allocation4], 0  ;;  %s1882_s0 = inlined_call_operand.hbm [shape: bf16[512,128], index: 0, kind: input, shape index: {}]   ;;  %s1883_s1 = inlined_call_operand.hbm [shape: bf16[128,128], index: 1, kind: input, shape index: {}]   ;;  %s1884_s2 = inlined_call_operand.vmem [shape: f32[1,128], index: 2, kind: input, shape index: {}]   ;;  %s1885_s3 = inlined_call_operand.hbm [shape: bf16[512,128], index: 3, kind: output, shape index: {}]  }
   0x1   :  { %9 = vsyncpa [#allocation7], 0 }
   0x2   :  { %10 = vsyncpa [#allocation5], 0  ;;  %s15_s14 = sshll.u32 %s1882_s0, 4  ;;  %s1770_s15 = smov [#allocation3]   ;;  %s16_s14 = int_to_ptr.hbm [resolvable:$true] %s15_s14 }
   0x3   :  { %s17_s16 = sshll.u32 %s1770_s15, 4  ;;  %s28_s19 = sshll.u32 %s1883_s1, 4  ;;  %s18_s16 = int_to_ptr.vmem [resolvable:$true] %s17_s16  ;;  %s29_s19 = int_to_ptr.hbm [resolvable:$true] %s28_s19 }
   0x4   :  { %s1771_s20 = smov 64   ;;  %s1772_s21 = smov 4  }
   0x5   :  { %23 = dma.hbm_to_vmem [thread:$0]  %s16_s14, 4096, %s18_s16, [#allocation4], %s1771_s20, %s1771_s20, %s1772_s21  }
   0x6   :  { %s1773_s22 = smov [#allocation6]  }
   0x7   :  { %s30_s23 = sshll.u32 %s1773_s22, 4  ;;  %s31_s23 = int_to_ptr.vmem [resolvable:$true] %s30_s23 }
   0x8   :  { %36 = dma.hbm_to_vmem [thread:$0]  %s29_s19, 1024, %s31_s23, [#allocation7], %s1771_s20, %s1771_s20, %s1772_s21  }
   0x9   :  { %1764 = dma.done.wait [#allocation4], 4096  }
   0xa   :  { %1765 = vsyncadd [#allocation4], 4294963200 }
   0xb   :  { %1766 = dma.done.wait [#allocation7], 1024  }
   0xc   :  { %1767 = vsyncadd [#allocation7], 4294966272  ;;  %v1470_v0 = vld [vmem:[#allocation6 + $0x38] sm:$0xff]  ;;  %v1469_v1 = vld [vmem:[#allocation6 + $0x30] sm:$0xff]  ;;  %s1257_s27 = sshll.u32 %s1885_s3, 4  ;;  %s1258_s27 = int_to_ptr.hbm [resolvable:$true] %s1257_s27 }
   0xd   :  { %499 = vmatpush.bf16.msra.mxu0 %v1470_v0  ;;  %1662 = vmatpush.bf16.msra.mxu1 %v1470_v0  ;;  %v1468_v2 = vld [vmem:[#allocation6 + $0x28] sm:$0xff]  ;;  %v1467_v3 = vld [vmem:[#allocation6 + $0x20] sm:$0xff]  ;;  %v1466_v4 = vld [vmem:[#allocation6 + $0x18] sm:$0xff] }
   0xe   :  { %1663 = vmatpush.bf16.msra.mxu2 %v1470_v0  ;;  %1664 = vmatpush.bf16.msra.mxu3 %v1470_v0  ;;  %v1465_v5 = vld [vmem:[#allocation6 + $0x10] sm:$0xff]  ;;  %v1464_v6 = vld [vmem:[#allocation6 + $0x8] sm:$0xff]  ;;  %v1463_v7 = vld [vmem:[#allocation6] sm:$0xff] }
   0xf   :  { %v1431_v8 = vld [vmem:[#allocation3] sm:$0xff]  ;;  %v1432_v12 = vld [vmem:[#allocation3 + $0x8] sm:$0xff]  ;;  %v1433_v16 = vld [vmem:[#allocation3 + $0x10] sm:$0xff] }
  0x10   :  { %v1439_v9 = vld [vmem:[#allocation3 + $0x40] sm:$0xff]  ;;  %v1440_v13 = vld [vmem:[#allocation3 + $0x48] sm:$0xff]  ;;  %v1441_v17 = vld [vmem:[#allocation3 + $0x50] sm:$0xff] }
  0x11   :  { %500 = vmatpush.bf16.msra.mxu0 %v1469_v1  ;;  %1665 = vmatpush.bf16.msra.mxu1 %v1469_v1  ;;  %v1447_v10 = vld [vmem:[#allocation3 + $0x80] sm:$0xff]  ;;  %v1448_v14 = vld [vmem:[#allocation3 + $0x88] sm:$0xff]  ;;  %v1449_v18 = vld [vmem:[#allocation3 + $0x90] sm:$0xff] }
  0x12   :  { %1666 = vmatpush.bf16.msra.mxu2 %v1469_v1  ;;  %1667 = vmatpush.bf16.msra.mxu3 %v1469_v1  ;;  %v1455_v11 = vld [vmem:[#allocation3 + $0xc0] sm:$0xff]  ;;  %v1456_v15 = vld [vmem:[#allocation3 + $0xc8] sm:$0xff]  ;;  %v1457_v19 = vld [vmem:[#allocation3 + $0xd0] sm:$0xff] }
  0x13   :  { %v1434_v20 = vld [vmem:[#allocation3 + $0x18] sm:$0xff]  ;;  %v1435_v24 = vld [vmem:[#allocation3 + $0x20] sm:$0xff]  ;;  %v1436_v28 = vld [vmem:[#allocation3 + $0x28] sm:$0xff] }
  0x14   :  { %v1442_v21 = vld [vmem:[#allocation3 + $0x58] sm:$0xff]  ;;  %v1443_v25 = vld [vmem:[#allocation3 + $0x60] sm:$0xff]  ;;  %v1444_v29 = vld [vmem:[#allocation3 + $0x68] sm:$0xff] }
  0x15   :  { %501 = vmatpush.bf16.msra.mxu0 %v1468_v2  ;;  %1668 = vmatpush.bf16.msra.mxu1 %v1468_v2  ;;  %v1450_v22 = vld [vmem:[#allocation3 + $0x98] sm:$0xff]  ;;  %v1451_v26 = vld [vmem:[#allocation3 + $0xa0] sm:$0xff]  ;;  %v1452_v30 = vld [vmem:[#allocation3 + $0xa8] sm:$0xff] }
  0x16   :  { %1669 = vmatpush.bf16.msra.mxu2 %v1468_v2  ;;  %1670 = vmatpush.bf16.msra.mxu3 %v1468_v2  ;;  %v1458_v23 = vld [vmem:[#allocation3 + $0xd8] sm:$0xff]  ;;  %v1459_v27 = vld [vmem:[#allocation3 + $0xe0] sm:$0xff]  ;;  %v1460_v31 = vld [vmem:[#allocation3 + $0xe8] sm:$0xff] }
  0x17   :  { %v1437_v32 = vld [vmem:[#allocation3 + $0x30] sm:$0xff]  ;;  %v1438_v36 = vld [vmem:[#allocation3 + $0x38] sm:$0xff]  ;;  %v1810_v42 = vld [vmem:[%s1884_s2] ss:$0 sm:$0xff]  ;;  %s1774_s2 = smov [#allocation8]  }
  0x18   :  { %v1445_v33 = vld [vmem:[#allocation3 + $0x70] sm:$0xff]  ;;  %v1446_v37 = vld [vmem:[#allocation3 + $0x78] sm:$0xff]  ;;  %s1255_s24 = sshll.u32 %s1774_s2, 4  ;;  %s1256_s24 = int_to_ptr.vmem [resolvable:$true] %s1255_s24 }
  0x19   :  { %502 = vmatpush.bf16.msra.mxu0 %v1467_v3  ;;  %1671 = vmatpush.bf16.msra.mxu1 %v1467_v3  ;;  %v1453_v34 = vld [vmem:[#allocation3 + $0xb0] sm:$0xff]  ;;  %v1454_v38 = vld [vmem:[#allocation3 + $0xb8] sm:$0xff] }
  0x1a   :  { %1672 = vmatpush.bf16.msra.mxu2 %v1467_v3  ;;  %1673 = vmatpush.bf16.msra.mxu3 %v1467_v3  ;;  %v1461_v35 = vld [vmem:[#allocation3 + $0xf0] sm:$0xff]  ;;  %v1462_v39 = vld [vmem:[#allocation3 + $0xf8] sm:$0xff] }
  0x1d   :  { %503 = vmatpush.bf16.msra.mxu0 %v1466_v4  ;;  %1674 = vmatpush.bf16.msra.mxu1 %v1466_v4 }
  0x1e   :  { %1675 = vmatpush.bf16.msra.mxu2 %v1466_v4  ;;  %1676 = vmatpush.bf16.msra.mxu3 %v1466_v4 }
  0x21   :  { %504 = vmatpush.bf16.msra.mxu0 %v1465_v5  ;;  %1677 = vmatpush.bf16.msra.mxu1 %v1465_v5 }
  0x22   :  { %1678 = vmatpush.bf16.msra.mxu2 %v1465_v5  ;;  %1679 = vmatpush.bf16.msra.mxu3 %v1465_v5 }
  0x25   :  { %505 = vmatpush.bf16.msra.mxu0 %v1464_v6  ;;  %1680 = vmatpush.bf16.msra.mxu1 %v1464_v6 }
  0x26   :  { %1681 = vmatpush.bf16.msra.mxu2 %v1464_v6  ;;  %1682 = vmatpush.bf16.msra.mxu3 %v1464_v6 }
  0x29   :  { %506 = vmatpush.bf16.msra.mxu0 %v1463_v7  ;;  %1683 = vmatpush.bf16.msra.mxu1 %v1463_v7 }
  0x2a   :  { %1684 = vmatpush.bf16.msra.mxu2 %v1463_v7  ;;  %1685 = vmatpush.bf16.msra.mxu3 %v1463_v7 }
  0x2c   :  { %507 = vmatmul.bf16.vlgmr.msra.gmra.mxu0 %v1431_v8  ;;  %547 = vmatmul.bf16.vlgmr.msra.gmra.mxu1 %v1439_v9 }
  0x2d   :  { %587 = vmatmul.bf16.vlgmr.msra.gmra.mxu2 %v1447_v10  ;;  %627 = vmatmul.bf16.vlgmr.msra.gmra.mxu3 %v1455_v11 }
  0x3c   :  { %512 = vmatmul.bf16.gmra.mxu0 %v1432_v12  ;;  %552 = vmatmul.bf16.gmra.mxu1 %v1440_v13 }
  0x3d   :  { %592 = vmatmul.bf16.gmra.mxu2 %v1448_v14  ;;  %632 = vmatmul.bf16.gmra.mxu3 %v1456_v15 }
  0x4c   :  { %517 = vmatmul.bf16.gmra.mxu0 %v1433_v16  ;;  %557 = vmatmul.bf16.gmra.mxu1 %v1441_v17 }
  0x4d   :  { %597 = vmatmul.bf16.gmra.mxu2 %v1449_v18  ;;  %637 = vmatmul.bf16.gmra.mxu3 %v1457_v19 }
  0x5c   :  { %522 = vmatmul.bf16.gmra.mxu0 %v1434_v20  ;;  %562 = vmatmul.bf16.gmra.mxu1 %v1442_v21 }
  0x5d   :  { %602 = vmatmul.bf16.gmra.mxu2 %v1450_v22  ;;  %642 = vmatmul.bf16.gmra.mxu3 %v1458_v23 }
  0x6c   :  { %527 = vmatmul.bf16.gmra.mxu0 %v1435_v24  ;;  %567 = vmatmul.bf16.gmra.mxu1 %v1443_v25 }
  0x6d   :  { %607 = vmatmul.bf16.gmra.mxu2 %v1451_v26  ;;  %647 = vmatmul.bf16.gmra.mxu3 %v1459_v27 }
  0x7c   :  { %532 = vmatmul.bf16.gmra.mxu0 %v1436_v28  ;;  %572 = vmatmul.bf16.gmra.mxu1 %v1444_v29 }
  0x7d   :  { %612 = vmatmul.bf16.gmra.mxu2 %v1452_v30  ;;  %652 = vmatmul.bf16.gmra.mxu3 %v1460_v31 }
  0x8c   :  { %537 = vmatmul.bf16.gmra.mxu0 %v1437_v32  ;;  %577 = vmatmul.bf16.gmra.mxu1 %v1445_v33 }
  0x8d   :  { %617 = vmatmul.bf16.gmra.mxu2 %v1453_v34  ;;  %657 = vmatmul.bf16.gmra.mxu3 %v1461_v35 }
  0x9c   :  { %542 = vmatmul.bf16.gmra.mxu0 %v1438_v36  ;;  %582 = vmatmul.bf16.gmra.mxu1 %v1446_v37 }
  0x9d   :  { %622 = vmatmul.bf16.gmra.mxu2 %v1454_v38  ;;  %662 = vmatmul.bf16.gmra.mxu3 %v1462_v39 }
  0xa9   :  { %v508_v40 = vpop.f32.mrf.mxu0  ;;  %v548_v41 = vpop.f32.mrf.mxu1 }
  0xaa   :  { %v867_v43 = vadd.f32 %v1810_v42, %v508_v40  ;;  %v883_v44 = vadd.f32 %v1810_v42, %v548_v41 }
  0xac   :  { %v995_v49 = vmul.f32 0.2, %v867_v43  ;;  %v1011_v50 = vmul.f32 0.2, %v883_v44  ;;  %vm931_vm0 = vcmp.ge.f32.partialorder %v867_v43, 0.0  ;;  %vm947_vm1 = vcmp.ge.f32.partialorder %v883_v44, 0.0 }
  0xae   :  { %v1059_v57 = vsel %vm931_vm0, %v867_v43, %v995_v49  ;;  %v1075_v58 = vsel %vm947_vm1, %v883_v44, %v1011_v50 }
  0xb0   :  { %v588_v45 = vpop.f32.mrf.mxu2  ;;  %v628_v46 = vpop.f32.mrf.mxu3 }
  0xb1   :  { %v510_v47 = vpop.f32.mrf.mxu0  ;;  %v550_v48 = vpop.f32.mrf.mxu1  ;;  %v899_v55 = vadd.f32 %v1810_v42, %v588_v45  ;;  %v915_v56 = vadd.f32 %v1810_v42, %v628_v46 }
  0xb2   :  { %v868_v51 = vadd.f32 %v1810_v42, %v510_v47  ;;  %v884_v52 = vadd.f32 %v1810_v42, %v550_v48 }
  0xb3   :  { %v1027_v1 = vmul.f32 0.2, %v899_v55  ;;  %v1043_v2 = vmul.f32 0.2, %v915_v56  ;;  %vm963_vm4 = vcmp.ge.f32.partialorder %v899_v55, 0.0  ;;  %vm979_vm5 = vcmp.ge.f32.partialorder %v915_v56, 0.0 }
  0xb4   :  { %vm932_vm2 = vcmp.ge.f32.partialorder %v868_v51, 0.0  ;;  %v996_v53 = vmul.f32 0.2, %v868_v51  ;;  %vm948_vm3 = vcmp.ge.f32.partialorder %v884_v52, 0.0  ;;  %v1012_v54 = vmul.f32 0.2, %v884_v52 }
  0xb5   :  { %v1091_v9 = vsel %vm963_vm4, %v899_v55, %v1027_v1  ;;  %v1107_v10 = vsel %vm979_vm5, %v915_v56, %v1043_v2 }
  0xb6   :  { %v1060_v59 = vsel %vm932_vm2, %v868_v51, %v996_v53  ;;  %v1076_v60 = vsel %vm948_vm3, %v884_v52, %v1012_v54 }
  0xb7   :  { %v1474_v61 = vpack.c.bf16 %v1060_v59, %v1059_v57  ;;  %v1514_v62 = vpack.c.bf16 %v1076_v60, %v1075_v58 }
  0xb8   :  { %v590_v63 = vpop.f32.mrf.mxu2  ;;  %v630_v0 = vpop.f32.mrf.mxu3 }
  0xb9   :  { %1475 = vst [vmem:[#allocation8] sm:$0xff] %v1474_v61   ;;  %v900_v3 = vadd.f32 %v1810_v42, %v590_v63  ;;  %v916_v4 = vadd.f32 %v1810_v42, %v630_v0  ;;  %v513_v5 = vpop.f32.mrf.mxu0  ;;  %v553_v6 = vpop.f32.mrf.mxu1 }
  0xba   :  { %1638 = vst [vmem:[#allocation8 + $0x40] sm:$0xff] %v1514_v62   ;;  %v869_v15 = vadd.f32 %v1810_v42, %v513_v5  ;;  %v885_v16 = vadd.f32 %v1810_v42, %v553_v6 }
  0xbb   :  { %vm964_vm6 = vcmp.ge.f32.partialorder %v900_v3, 0.0  ;;  %v1028_v7 = vmul.f32 0.2, %v900_v3  ;;  %vm980_vm7 = vcmp.ge.f32.partialorder %v916_v4, 0.0  ;;  %v1044_v8 = vmul.f32 0.2, %v916_v4 }
  0xbc   :  { %v997_v21 = vmul.f32 0.2, %v869_v15  ;;  %v1013_v22 = vmul.f32 0.2, %v885_v16  ;;  %vm933_vm8 = vcmp.ge.f32.partialorder %v869_v15, 0.0  ;;  %vm949_vm9 = vcmp.ge.f32.partialorder %v885_v16, 0.0 }
  0xbd   :  { %v1092_v11 = vsel %vm964_vm6, %v900_v3, %v1028_v7  ;;  %v1108_v12 = vsel %vm980_vm7, %v916_v4, %v1044_v8 }
  0xbe   :  { %v1554_v13 = vpack.c.bf16 %v1092_v11, %v1091_v9  ;;  %v1594_v14 = vpack.c.bf16 %v1108_v12, %v1107_v10  ;;  %v1061_v29 = vsel %vm933_vm8, %v869_v15, %v997_v21  ;;  %v1077_v30 = vsel %vm949_vm9, %v885_v16, %v1013_v22 }
  0xc0   :  { %1646 = vst [vmem:[#allocation8 + $0x80] sm:$0xff] %v1554_v13   ;;  %v593_v17 = vpop.f32.mrf.mxu2  ;;  %v633_v18 = vpop.f32.mrf.mxu3 }
  0xc1   :  { %1654 = vst [vmem:[#allocation8 + $0xc0] sm:$0xff] %v1594_v14   ;;  %v515_v19 = vpop.f32.mrf.mxu0  ;;  %v555_v20 = vpop.f32.mrf.mxu1  ;;  %v901_v27 = vadd.f32 %v1810_v42, %v593_v17  ;;  %v917_v28 = vadd.f32 %v1810_v42, %v633_v18 }
  0xc2   :  { %v870_v23 = vadd.f32 %v1810_v42, %v515_v19  ;;  %v886_v24 = vadd.f32 %v1810_v42, %v555_v20 }
  0xc3   :  { %v1029_v37 = vmul.f32 0.2, %v901_v27  ;;  %v1045_v38 = vmul.f32 0.2, %v917_v28  ;;  %vm965_vm12 = vcmp.ge.f32.partialorder %v901_v27, 0.0  ;;  %vm981_vm13 = vcmp.ge.f32.partialorder %v917_v28, 0.0 }
  0xc4   :  { %vm934_vm10 = vcmp.ge.f32.partialorder %v870_v23, 0.0  ;;  %v998_v25 = vmul.f32 0.2, %v870_v23  ;;  %vm950_vm11 = vcmp.ge.f32.partialorder %v886_v24, 0.0  ;;  %v1014_v26 = vmul.f32 0.2, %v886_v24 }
  0xc5   :  { %v1093_v46 = vsel %vm965_vm12, %v901_v27, %v1029_v37  ;;  %v1109_v47 = vsel %vm981_vm13, %v917_v28, %v1045_v38 }
  0xc6   :  { %v1062_v31 = vsel %vm934_vm10, %v870_v23, %v998_v25  ;;  %v1078_v32 = vsel %vm950_vm11, %v886_v24, %v1014_v26 }
  0xc7   :  { %v1479_v33 = vpack.c.bf16 %v1062_v31, %v1061_v29  ;;  %v1519_v34 = vpack.c.bf16 %v1078_v32, %v1077_v30 }
  0xc8   :  { %v595_v35 = vpop.f32.mrf.mxu2  ;;  %v635_v36 = vpop.f32.mrf.mxu3 }
  0xc9   :  { %1631 = vst [vmem:[#allocation8 + $0x8] sm:$0xff] %v1479_v33   ;;  %v902_v39 = vadd.f32 %v1810_v42, %v595_v35  ;;  %v918_v40 = vadd.f32 %v1810_v42, %v635_v36  ;;  %v518_v41 = vpop.f32.mrf.mxu0  ;;  %v558_v43 = vpop.f32.mrf.mxu1 }
  0xca   :  { %1639 = vst [vmem:[#allocation8 + $0x48] sm:$0xff] %v1519_v34   ;;  %v871_v52 = vadd.f32 %v1810_v42, %v518_v41  ;;  %v887_v53 = vadd.f32 %v1810_v42, %v558_v43 }
  0xcb   :  { %vm966_vm14 = vcmp.ge.f32.partialorder %v902_v39, 0.0  ;;  %v1030_v44 = vmul.f32 0.2, %v902_v39  ;;  %vm982_vm15 = vcmp.ge.f32.partialorder %v918_v40, 0.0  ;;  %v1046_v45 = vmul.f32 0.2, %v918_v40 }
  0xcc   :  { %v999_v58 = vmul.f32 0.2, %v871_v52  ;;  %v1015_v59 = vmul.f32 0.2, %v887_v53  ;;  %vm935_vm0 = vcmp.ge.f32.partialorder %v871_v52, 0.0  ;;  %vm951_vm1 = vcmp.ge.f32.partialorder %v887_v53, 0.0 }
  0xcd   :  { %v1094_v48 = vsel %vm966_vm14, %v902_v39, %v1030_v44  ;;  %v1110_v49 = vsel %vm982_vm15, %v918_v40, %v1046_v45 }
  0xce   :  { %v1559_v50 = vpack.c.bf16 %v1094_v48, %v1093_v46  ;;  %v1599_v51 = vpack.c.bf16 %v1110_v49, %v1109_v47  ;;  %v1063_v2 = vsel %vm935_vm0, %v871_v52, %v999_v58  ;;  %v1079_v3 = vsel %vm951_vm1, %v887_v53, %v1015_v59 }
  0xd0   :  { %1647 = vst [vmem:[#allocation8 + $0x88] sm:$0xff] %v1559_v50   ;;  %v598_v54 = vpop.f32.mrf.mxu2  ;;  %v638_v55 = vpop.f32.mrf.mxu3 }
  0xd1   :  { %1655 = vst [vmem:[#allocation8 + $0xc8] sm:$0xff] %v1599_v51   ;;  %v520_v56 = vpop.f32.mrf.mxu0  ;;  %v560_v57 = vpop.f32.mrf.mxu1  ;;  %v903_v0 = vadd.f32 %v1810_v42, %v598_v54  ;;  %v919_v1 = vadd.f32 %v1810_v42, %v638_v55 }
  0xd2   :  { %v872_v60 = vadd.f32 %v1810_v42, %v520_v56  ;;  %v888_v61 = vadd.f32 %v1810_v42, %v560_v57 }
  0xd3   :  { %v1031_v10 = vmul.f32 0.2, %v903_v0  ;;  %v1047_v11 = vmul.f32 0.2, %v919_v1  ;;  %vm967_vm4 = vcmp.ge.f32.partialorder %v903_v0, 0.0  ;;  %vm983_vm5 = vcmp.ge.f32.partialorder %v919_v1, 0.0 }
  0xd4   :  { %vm936_vm2 = vcmp.ge.f32.partialorder %v872_v60, 0.0  ;;  %v1000_v62 = vmul.f32 0.2, %v872_v60  ;;  %vm952_vm3 = vcmp.ge.f32.partialorder %v888_v61, 0.0  ;;  %v1016_v63 = vmul.f32 0.2, %v888_v61 }
  0xd5   :  { %v1095_v18 = vsel %vm967_vm4, %v903_v0, %v1031_v10  ;;  %v1111_v19 = vsel %vm983_vm5, %v919_v1, %v1047_v11 }
  0xd6   :  { %v1064_v4 = vsel %vm936_vm2, %v872_v60, %v1000_v62  ;;  %v1080_v5 = vsel %vm952_vm3, %v888_v61, %v1016_v63 }
  0xd7   :  { %v1484_v6 = vpack.c.bf16 %v1064_v4, %v1063_v2  ;;  %v1524_v7 = vpack.c.bf16 %v1080_v5, %v1079_v3 }
  0xd8   :  { %v600_v8 = vpop.f32.mrf.mxu2  ;;  %v640_v9 = vpop.f32.mrf.mxu3 }
  0xd9   :  { %1632 = vst [vmem:[#allocation8 + $0x10] sm:$0xff] %v1484_v6   ;;  %v904_v12 = vadd.f32 %v1810_v42, %v600_v8  ;;  %v920_v13 = vadd.f32 %v1810_v42, %v640_v9  ;;  %v523_v14 = vpop.f32.mrf.mxu0  ;;  %v563_v15 = vpop.f32.mrf.mxu1 }
  0xda   :  { %1640 = vst [vmem:[#allocation8 + $0x50] sm:$0xff] %v1524_v7   ;;  %v873_v24 = vadd.f32 %v1810_v42, %v523_v14  ;;  %v889_v25 = vadd.f32 %v1810_v42, %v563_v15 }
  0xdb   :  { %vm968_vm6 = vcmp.ge.f32.partialorder %v904_v12, 0.0  ;;  %v1032_v16 = vmul.f32 0.2, %v904_v12  ;;  %vm984_vm7 = vcmp.ge.f32.partialorder %v920_v13, 0.0  ;;  %v1048_v17 = vmul.f32 0.2, %v920_v13 }
  0xdc   :  { %v1001_v30 = vmul.f32 0.2, %v873_v24  ;;  %v1017_v31 = vmul.f32 0.2, %v889_v25  ;;  %vm937_vm8 = vcmp.ge.f32.partialorder %v873_v24, 0.0  ;;  %vm953_vm9 = vcmp.ge.f32.partialorder %v889_v25, 0.0 }
  0xdd   :  { %v1096_v20 = vsel %vm968_vm6, %v904_v12, %v1032_v16  ;;  %v1112_v21 = vsel %vm984_vm7, %v920_v13, %v1048_v17 }
  0xde   :  { %v1564_v22 = vpack.c.bf16 %v1096_v20, %v1095_v18  ;;  %v1604_v23 = vpack.c.bf16 %v1112_v21, %v1111_v19  ;;  %v1065_v38 = vsel %vm937_vm8, %v873_v24, %v1001_v30  ;;  %v1081_v39 = vsel %vm953_vm9, %v889_v25, %v1017_v31 }
  0xe0   :  { %1648 = vst [vmem:[#allocation8 + $0x90] sm:$0xff] %v1564_v22   ;;  %v603_v26 = vpop.f32.mrf.mxu2  ;;  %v643_v27 = vpop.f32.mrf.mxu3 }
  0xe1   :  { %1656 = vst [vmem:[#allocation8 + $0xd0] sm:$0xff] %v1604_v23   ;;  %v525_v28 = vpop.f32.mrf.mxu0  ;;  %v565_v29 = vpop.f32.mrf.mxu1  ;;  %v905_v36 = vadd.f32 %v1810_v42, %v603_v26  ;;  %v921_v37 = vadd.f32 %v1810_v42, %v643_v27 }
  0xe2   :  { %v874_v32 = vadd.f32 %v1810_v42, %v525_v28  ;;  %v890_v33 = vadd.f32 %v1810_v42, %v565_v29 }
  0xe3   :  { %v1033_v47 = vmul.f32 0.2, %v905_v36  ;;  %v1049_v48 = vmul.f32 0.2, %v921_v37  ;;  %vm969_vm12 = vcmp.ge.f32.partialorder %v905_v36, 0.0  ;;  %vm985_vm13 = vcmp.ge.f32.partialorder %v921_v37, 0.0 }
  0xe4   :  { %vm938_vm10 = vcmp.ge.f32.partialorder %v874_v32, 0.0  ;;  %v1002_v34 = vmul.f32 0.2, %v874_v32  ;;  %vm954_vm11 = vcmp.ge.f32.partialorder %v890_v33, 0.0  ;;  %v1018_v35 = vmul.f32 0.2, %v890_v33 }
  0xe5   :  { %v1097_v55 = vsel %vm969_vm12, %v905_v36, %v1033_v47  ;;  %v1113_v56 = vsel %vm985_vm13, %v921_v37, %v1049_v48 }
  0xe6   :  { %v1066_v40 = vsel %vm938_vm10, %v874_v32, %v1002_v34  ;;  %v1082_v41 = vsel %vm954_vm11, %v890_v33, %v1018_v35 }
  0xe7   :  { %v1489_v43 = vpack.c.bf16 %v1066_v40, %v1065_v38  ;;  %v1529_v44 = vpack.c.bf16 %v1082_v41, %v1081_v39 }
  0xe8   :  { %v605_v45 = vpop.f32.mrf.mxu2  ;;  %v645_v46 = vpop.f32.mrf.mxu3 }
  0xe9   :  { %1633 = vst [vmem:[#allocation8 + $0x18] sm:$0xff] %v1489_v43   ;;  %v906_v49 = vadd.f32 %v1810_v42, %v605_v45  ;;  %v922_v50 = vadd.f32 %v1810_v42, %v645_v46  ;;  %v528_v51 = vpop.f32.mrf.mxu0  ;;  %v568_v52 = vpop.f32.mrf.mxu1 }
  0xea   :  { %1641 = vst [vmem:[#allocation8 + $0x58] sm:$0xff] %v1529_v44   ;;  %v875_v61 = vadd.f32 %v1810_v42, %v528_v51  ;;  %v891_v62 = vadd.f32 %v1810_v42, %v568_v52 }
  0xeb   :  { %vm970_vm14 = vcmp.ge.f32.partialorder %v906_v49, 0.0  ;;  %v1034_v53 = vmul.f32 0.2, %v906_v49  ;;  %vm986_vm15 = vcmp.ge.f32.partialorder %v922_v50, 0.0  ;;  %v1050_v54 = vmul.f32 0.2, %v922_v50 }
  0xec   :  { %v1003_v3 = vmul.f32 0.2, %v875_v61  ;;  %v1019_v4 = vmul.f32 0.2, %v891_v62  ;;  %vm939_vm0 = vcmp.ge.f32.partialorder %v875_v61, 0.0  ;;  %vm955_vm1 = vcmp.ge.f32.partialorder %v891_v62, 0.0 }
  0xed   :  { %v1098_v57 = vsel %vm970_vm14, %v906_v49, %v1034_v53  ;;  %v1114_v58 = vsel %vm986_vm15, %v922_v50, %v1050_v54 }
  0xee   :  { %v1569_v59 = vpack.c.bf16 %v1098_v57, %v1097_v55  ;;  %v1609_v60 = vpack.c.bf16 %v1114_v58, %v1113_v56  ;;  %v1067_v11 = vsel %vm939_vm0, %v875_v61, %v1003_v3  ;;  %v1083_v12 = vsel %vm955_vm1, %v891_v62, %v1019_v4 }
  0xf0   :  { %1649 = vst [vmem:[#allocation8 + $0x98] sm:$0xff] %v1569_v59   ;;  %v608_v63 = vpop.f32.mrf.mxu2  ;;  %v648_v0 = vpop.f32.mrf.mxu3 }
  0xf1   :  { %1657 = vst [vmem:[#allocation8 + $0xd8] sm:$0xff] %v1609_v60   ;;  %v530_v1 = vpop.f32.mrf.mxu0  ;;  %v570_v2 = vpop.f32.mrf.mxu1  ;;  %v907_v9 = vadd.f32 %v1810_v42, %v608_v63  ;;  %v923_v10 = vadd.f32 %v1810_v42, %v648_v0 }
  0xf2   :  { %v876_v5 = vadd.f32 %v1810_v42, %v530_v1  ;;  %v892_v6 = vadd.f32 %v1810_v42, %v570_v2 }
  0xf3   :  { %v1035_v19 = vmul.f32 0.2, %v907_v9  ;;  %v1051_v20 = vmul.f32 0.2, %v923_v10  ;;  %vm971_vm4 = vcmp.ge.f32.partialorder %v907_v9, 0.0  ;;  %vm987_vm5 = vcmp.ge.f32.partialorder %v923_v10, 0.0 }
  0xf4   :  { %vm940_vm2 = vcmp.ge.f32.partialorder %v876_v5, 0.0  ;;  %v1004_v7 = vmul.f32 0.2, %v876_v5  ;;  %vm956_vm3 = vcmp.ge.f32.partialorder %v892_v6, 0.0  ;;  %v1020_v8 = vmul.f32 0.2, %v892_v6 }
  0xf5   :  { %v1099_v27 = vsel %vm971_vm4, %v907_v9, %v1035_v19  ;;  %v1115_v28 = vsel %vm987_vm5, %v923_v10, %v1051_v20 }
  0xf6   :  { %v1068_v13 = vsel %vm940_vm2, %v876_v5, %v1004_v7  ;;  %v1084_v14 = vsel %vm956_vm3, %v892_v6, %v1020_v8 }
  0xf7   :  { %v1494_v15 = vpack.c.bf16 %v1068_v13, %v1067_v11  ;;  %v1534_v16 = vpack.c.bf16 %v1084_v14, %v1083_v12 }
  0xf8   :  { %v610_v17 = vpop.f32.mrf.mxu2  ;;  %v650_v18 = vpop.f32.mrf.mxu3 }
  0xf9   :  { %1634 = vst [vmem:[#allocation8 + $0x20] sm:$0xff] %v1494_v15   ;;  %v908_v21 = vadd.f32 %v1810_v42, %v610_v17  ;;  %v924_v22 = vadd.f32 %v1810_v42, %v650_v18  ;;  %v533_v23 = vpop.f32.mrf.mxu0  ;;  %v573_v24 = vpop.f32.mrf.mxu1 }
  0xfa   :  { %1642 = vst [vmem:[#allocation8 + $0x60] sm:$0xff] %v1534_v16   ;;  %v877_v33 = vadd.f32 %v1810_v42, %v533_v23  ;;  %v893_v34 = vadd.f32 %v1810_v42, %v573_v24 }
  0xfb   :  { %vm972_vm6 = vcmp.ge.f32.partialorder %v908_v21, 0.0  ;;  %v1036_v25 = vmul.f32 0.2, %v908_v21  ;;  %vm988_vm7 = vcmp.ge.f32.partialorder %v924_v22, 0.0  ;;  %v1052_v26 = vmul.f32 0.2, %v924_v22 }
  0xfc   :  { %v1005_v39 = vmul.f32 0.2, %v877_v33  ;;  %v1021_v40 = vmul.f32 0.2, %v893_v34  ;;  %vm941_vm8 = vcmp.ge.f32.partialorder %v877_v33, 0.0  ;;  %vm957_vm9 = vcmp.ge.f32.partialorder %v893_v34, 0.0 }
  0xfd   :  { %v1100_v29 = vsel %vm972_vm6, %v908_v21, %v1036_v25  ;;  %v1116_v30 = vsel %vm988_vm7, %v924_v22, %v1052_v26 }
  0xfe   :  { %v1574_v31 = vpack.c.bf16 %v1100_v29, %v1099_v27  ;;  %v1614_v32 = vpack.c.bf16 %v1116_v30, %v1115_v28  ;;  %v1069_v48 = vsel %vm941_vm8, %v877_v33, %v1005_v39  ;;  %v1085_v49 = vsel %vm957_vm9, %v893_v34, %v1021_v40 }
 0x100   :  { %1650 = vst [vmem:[#allocation8 + $0xa0] sm:$0xff] %v1574_v31   ;;  %v613_v35 = vpop.f32.mrf.mxu2  ;;  %v653_v36 = vpop.f32.mrf.mxu3 }
 0x101   :  { %1658 = vst [vmem:[#allocation8 + $0xe0] sm:$0xff] %v1614_v32   ;;  %v535_v37 = vpop.f32.mrf.mxu0  ;;  %v575_v38 = vpop.f32.mrf.mxu1  ;;  %v909_v46 = vadd.f32 %v1810_v42, %v613_v35  ;;  %v925_v47 = vadd.f32 %v1810_v42, %v653_v36 }
 0x102   :  { %v878_v41 = vadd.f32 %v1810_v42, %v535_v37  ;;  %v894_v43 = vadd.f32 %v1810_v42, %v575_v38 }
 0x103   :  { %v1037_v56 = vmul.f32 0.2, %v909_v46  ;;  %v1053_v57 = vmul.f32 0.2, %v925_v47  ;;  %vm973_vm12 = vcmp.ge.f32.partialorder %v909_v46, 0.0  ;;  %vm989_vm13 = vcmp.ge.f32.partialorder %v925_v47, 0.0 }
 0x104   :  { %vm942_vm10 = vcmp.ge.f32.partialorder %v878_v41, 0.0  ;;  %v1006_v44 = vmul.f32 0.2, %v878_v41  ;;  %vm958_vm11 = vcmp.ge.f32.partialorder %v894_v43, 0.0  ;;  %v1022_v45 = vmul.f32 0.2, %v894_v43 }
 0x105   :  { %v1101_v0 = vsel %vm973_vm12, %v909_v46, %v1037_v56  ;;  %v1117_v1 = vsel %vm989_vm13, %v925_v47, %v1053_v57 }
 0x106   :  { %v1070_v50 = vsel %vm942_vm10, %v878_v41, %v1006_v44  ;;  %v1086_v51 = vsel %vm958_vm11, %v894_v43, %v1022_v45 }
 0x107   :  { %v1499_v52 = vpack.c.bf16 %v1070_v50, %v1069_v48  ;;  %v1539_v53 = vpack.c.bf16 %v1086_v51, %v1085_v49 }
 0x108   :  { %v615_v54 = vpop.f32.mrf.mxu2  ;;  %v655_v55 = vpop.f32.mrf.mxu3 }
 0x109   :  { %1635 = vst [vmem:[#allocation8 + $0x28] sm:$0xff] %v1499_v52   ;;  %v910_v58 = vadd.f32 %v1810_v42, %v615_v54  ;;  %v926_v59 = vadd.f32 %v1810_v42, %v655_v55  ;;  %v538_v60 = vpop.f32.mrf.mxu0  ;;  %v578_v61 = vpop.f32.mrf.mxu1 }
 0x10a   :  { %1643 = vst [vmem:[#allocation8 + $0x68] sm:$0xff] %v1539_v53   ;;  %v879_v6 = vadd.f32 %v1810_v42, %v538_v60  ;;  %v895_v7 = vadd.f32 %v1810_v42, %v578_v61 }
 0x10b   :  { %vm974_vm14 = vcmp.ge.f32.partialorder %v910_v58, 0.0  ;;  %v1038_v62 = vmul.f32 0.2, %v910_v58  ;;  %vm990_vm15 = vcmp.ge.f32.partialorder %v926_v59, 0.0  ;;  %v1054_v63 = vmul.f32 0.2, %v926_v59 }
 0x10c   :  { %v1007_v12 = vmul.f32 0.2, %v879_v6  ;;  %v1023_v13 = vmul.f32 0.2, %v895_v7  ;;  %vm943_vm0 = vcmp.ge.f32.partialorder %v879_v6, 0.0  ;;  %vm959_vm1 = vcmp.ge.f32.partialorder %v895_v7, 0.0 }
 0x10d   :  { %v1102_v2 = vsel %vm974_vm14, %v910_v58, %v1038_v62  ;;  %v1118_v3 = vsel %vm990_vm15, %v926_v59, %v1054_v63 }
 0x10e   :  { %v1579_v4 = vpack.c.bf16 %v1102_v2, %v1101_v0  ;;  %v1619_v5 = vpack.c.bf16 %v1118_v3, %v1117_v1  ;;  %v1071_v20 = vsel %vm943_vm0, %v879_v6, %v1007_v12  ;;  %v1087_v21 = vsel %vm959_vm1, %v895_v7, %v1023_v13 }
 0x110   :  { %1651 = vst [vmem:[#allocation8 + $0xa8] sm:$0xff] %v1579_v4   ;;  %v618_v8 = vpop.f32.mrf.mxu2  ;;  %v658_v9 = vpop.f32.mrf.mxu3 }
 0x111   :  { %1659 = vst [vmem:[#allocation8 + $0xe8] sm:$0xff] %v1619_v5   ;;  %v540_v10 = vpop.f32.mrf.mxu0  ;;  %v580_v11 = vpop.f32.mrf.mxu1  ;;  %v911_v18 = vadd.f32 %v1810_v42, %v618_v8  ;;  %v927_v19 = vadd.f32 %v1810_v42, %v658_v9 }
 0x112   :  { %v880_v14 = vadd.f32 %v1810_v42, %v540_v10  ;;  %v896_v15 = vadd.f32 %v1810_v42, %v580_v11 }
 0x113   :  { %v1039_v28 = vmul.f32 0.2, %v911_v18  ;;  %v1055_v29 = vmul.f32 0.2, %v927_v19  ;;  %vm975_vm4 = vcmp.ge.f32.partialorder %v911_v18, 0.0  ;;  %vm991_vm5 = vcmp.ge.f32.partialorder %v927_v19, 0.0 }
 0x114   :  { %vm944_vm2 = vcmp.ge.f32.partialorder %v880_v14, 0.0  ;;  %v1008_v16 = vmul.f32 0.2, %v880_v14  ;;  %vm960_vm3 = vcmp.ge.f32.partialorder %v896_v15, 0.0  ;;  %v1024_v17 = vmul.f32 0.2, %v896_v15 }
 0x115   :  { %v1103_v36 = vsel %vm975_vm4, %v911_v18, %v1039_v28  ;;  %v1119_v37 = vsel %vm991_vm5, %v927_v19, %v1055_v29 }
 0x116   :  { %v1072_v22 = vsel %vm944_vm2, %v880_v14, %v1008_v16  ;;  %v1088_v23 = vsel %vm960_vm3, %v896_v15, %v1024_v17 }
 0x117   :  { %v1504_v24 = vpack.c.bf16 %v1072_v22, %v1071_v20  ;;  %v1544_v25 = vpack.c.bf16 %v1088_v23, %v1087_v21 }
 0x118   :  { %v620_v26 = vpop.f32.mrf.mxu2  ;;  %v660_v27 = vpop.f32.mrf.mxu3 }
 0x119   :  { %1636 = vst [vmem:[#allocation8 + $0x30] sm:$0xff] %v1504_v24   ;;  %v912_v30 = vadd.f32 %v1810_v42, %v620_v26  ;;  %v928_v31 = vadd.f32 %v1810_v42, %v660_v27  ;;  %v543_v32 = vpop.f32.mrf.mxu0  ;;  %v583_v33 = vpop.f32.mrf.mxu1 }
 0x11a   :  { %1644 = vst [vmem:[#allocation8 + $0x70] sm:$0xff] %v1544_v25   ;;  %v881_v43 = vadd.f32 %v1810_v42, %v543_v32  ;;  %v897_v44 = vadd.f32 %v1810_v42, %v583_v33 }
 0x11b   :  { %vm976_vm6 = vcmp.ge.f32.partialorder %v912_v30, 0.0  ;;  %v1040_v34 = vmul.f32 0.2, %v912_v30  ;;  %vm992_vm7 = vcmp.ge.f32.partialorder %v928_v31, 0.0  ;;  %v1056_v35 = vmul.f32 0.2, %v928_v31 }
 0x11c   :  { %v1009_v49 = vmul.f32 0.2, %v881_v43  ;;  %v1025_v50 = vmul.f32 0.2, %v897_v44  ;;  %vm945_vm8 = vcmp.ge.f32.partialorder %v881_v43, 0.0  ;;  %vm961_vm9 = vcmp.ge.f32.partialorder %v897_v44, 0.0 }
 0x11d   :  { %v1104_v38 = vsel %vm976_vm6, %v912_v30, %v1040_v34  ;;  %v1120_v39 = vsel %vm992_vm7, %v928_v31, %v1056_v35 }
 0x11e   :  { %v1584_v40 = vpack.c.bf16 %v1104_v38, %v1103_v36  ;;  %v1624_v41 = vpack.c.bf16 %v1120_v39, %v1119_v37  ;;  %v1073_v57 = vsel %vm945_vm8, %v881_v43, %v1009_v49  ;;  %v1089_v58 = vsel %vm961_vm9, %v897_v44, %v1025_v50 }
 0x120   :  { %1652 = vst [vmem:[#allocation8 + $0xb0] sm:$0xff] %v1584_v40   ;;  %v623_v45 = vpop.f32.mrf.mxu2  ;;  %v663_v46 = vpop.f32.mrf.mxu3 }
 0x121   :  { %1660 = vst [vmem:[#allocation8 + $0xf0] sm:$0xff] %v1624_v41   ;;  %v545_v47 = vpop.f32.mrf.mxu0  ;;  %v585_v48 = vpop.f32.mrf.mxu1  ;;  %v913_v55 = vadd.f32 %v1810_v42, %v623_v45  ;;  %v929_v56 = vadd.f32 %v1810_v42, %v663_v46 }
 0x122   :  { %v882_v51 = vadd.f32 %v1810_v42, %v545_v47  ;;  %v898_v52 = vadd.f32 %v1810_v42, %v585_v48 }
 0x123   :  { %v1041_v1 = vmul.f32 0.2, %v913_v55  ;;  %v1057_v2 = vmul.f32 0.2, %v929_v56  ;;  %vm977_vm12 = vcmp.ge.f32.partialorder %v913_v55, 0.0  ;;  %vm993_vm13 = vcmp.ge.f32.partialorder %v929_v56, 0.0 }
 0x124   :  { %vm946_vm10 = vcmp.ge.f32.partialorder %v882_v51, 0.0  ;;  %v1010_v53 = vmul.f32 0.2, %v882_v51  ;;  %vm962_vm11 = vcmp.ge.f32.partialorder %v898_v52, 0.0  ;;  %v1026_v54 = vmul.f32 0.2, %v898_v52 }
 0x125   :  { %v1105_v7 = vsel %vm977_vm12, %v913_v55, %v1041_v1  ;;  %v1121_v8 = vsel %vm993_vm13, %v929_v56, %v1057_v2 }
 0x126   :  { %v1074_v59 = vsel %vm946_vm10, %v882_v51, %v1010_v53  ;;  %v1090_v60 = vsel %vm962_vm11, %v898_v52, %v1026_v54 }
 0x127   :  { %v1509_v61 = vpack.c.bf16 %v1074_v59, %v1073_v57  ;;  %v1549_v62 = vpack.c.bf16 %v1090_v60, %v1089_v58 }
 0x128   :  { %v625_v63 = vpop.f32.mrf.mxu2  ;;  %v665_v0 = vpop.f32.mrf.mxu3 }
 0x129   :  { %1637 = vst [vmem:[#allocation8 + $0x38] sm:$0xff] %v1509_v61   ;;  %v914_v3 = vadd.f32 %v1810_v42, %v625_v63  ;;  %v930_v4 = vadd.f32 %v1810_v42, %v665_v0 }
 0x12a   :  { %1645 = vst [vmem:[#allocation8 + $0x78] sm:$0xff] %v1549_v62  }
 0x12b   :  { %vm978_vm14 = vcmp.ge.f32.partialorder %v914_v3, 0.0  ;;  %v1042_v5 = vmul.f32 0.2, %v914_v3  ;;  %vm994_vm15 = vcmp.ge.f32.partialorder %v930_v4, 0.0  ;;  %v1058_v6 = vmul.f32 0.2, %v930_v4 }
 0x12d   :  { %v1106_v9 = vsel %vm978_vm14, %v914_v3, %v1042_v5  ;;  %v1122_v10 = vsel %vm994_vm15, %v930_v4, %v1058_v6 }
 0x12e   :  { %v1589_v11 = vpack.c.bf16 %v1106_v9, %v1105_v7  ;;  %v1629_v12 = vpack.c.bf16 %v1122_v10, %v1121_v8 }
 0x130   :  { %1653 = vst [vmem:[#allocation8 + $0xb8] sm:$0xff] %v1589_v11  }
 0x131   :  { %1661 = vst [vmem:[#allocation8 + $0xf8] sm:$0xff] %v1629_v12  }
 0x132   :  { %1263 = dma.vmem_to_hbm [thread:$0]  %s1256_s24, 4096, %s1258_s27, [#allocation5], %s1771_s20, %s1771_s20, %s1772_s21  }
 0x133   :  { %1768 = dma.done.wait [#allocation5], 4096  }
 0x134   :  { %1769 = vsyncadd [#allocation5], 4294963200 }
 0x135   :  { %1268 = vsyncpa [#allocation4], 1 }
 0x136   :  { %1269 = vsyncpa [#allocation7], 1 }
 0x137   :  { %1270 = vsyncpa [#allocation5], 1 }

</bundles_post_ra>
